<compile_context>
chip_gen: v5e
topology: v5e:2x2
jax: 0.10.0
libtpu: 0.0.40
codegen_flags: <defaults>
</compile_context>

<pallas_src>
import jax
import jax.numpy as jnp
from jax.experimental import pallas as pl
from jax.experimental.pallas import tpu as pltpu


def _make_csp_kernel(nb):
    """Kernel over a block of `nb` images: out[i] = W @ x[i] + b."""

    def kernel(x_ref, w_ref, b_ref, o_ref):
        # x_ref: (nb, Cin, TP)   w_ref: (Cout, Cin)   b_ref: (Cout, 1)
        # o_ref: (nb, Cout, TP)
        w = w_ref[...]          # resident across the whole grid (never re-DMAed)
        b = b_ref[...]

        def body(i, carry):
            xi = x_ref[i]                                            # (Cin, TP)
            out = jnp.dot(w, xi, preferred_element_type=jnp.float32) + b
            o_ref[i] = out.astype(o_ref.dtype)
            return carry

        jax.lax.fori_loop(0, nb, body, 0, unroll=True)

    return kernel


def _vmem_budgets():
    """Return (block_budget_bytes, vmem_limit_bytes), generation-aware."""
    try:
        cap = int(getattr(pltpu.get_tpu_info(), "vmem_capacity_bytes",
                          64 * 1024 * 1024))
    except Exception:                    # interpret mode / unknown chip
        cap = 64 * 1024 * 1024
    block_budget = min(cap // 4, 32 * 1024 * 1024)       # v7x: 16 MiB, v5e/v6e: 32 MiB
    vmem_limit = min((cap * 3) // 4, 96 * 1024 * 1024)   # v7x: 48 MiB, v5e/v6e: 96 MiB
    return block_budget, vmem_limit


def _choose_tiling(N, Cin, Cout, HW, in_itemsize, out_itemsize, budget_bytes):
    """Pick (nb images per step, pixel tile tp, padded pixel count HWp).

    budget_bytes bounds the double-buffered in+out block bytes of one step.
    """
    per_pixel = 2 * (Cin * in_itemsize + Cout * out_itemsize)   # dbl-buffered bytes/pixel
    per_image = per_pixel * HW

    if per_image <= budget_bytes:
        # Whole image(s) per grid step.  Batch small images to amortize the
        # per-step / DMA-descriptor overhead, but keep >= 2 grid steps when
        # N >= 2 so the v7x megacore can split the batch axis across cores.
        nb = 1
        max_nb = 1 if N == 1 else max(1, N // 2)
        for cand in range(max_nb, 0, -1):
            if N % cand == 0 and cand * per_image <= budget_bytes:
                nb = cand
                break
        return nb, HW, HW

    # Image too large for one block: tile the pixel axis with lane-dense
    # (multiple-of-128) tiles; pad HW if it is not already a lane multiple.
    hw128 = HW + ((-HW) % 128)
    cap = max(128, ((budget_bytes // per_pixel) // 128) * 128)
    tp = min(hw128, cap)
    for d in range(tp, 127, -128):       # prefer an exact divisor (no padding)
        if hw128 % d == 0:
            tp = d
            break
    if N == 1 and hw128 // tp < 2 and tp >= 256:
        # A single image would collapse to one grid step: split the pixel
        # loop so both v7x TensorCores get work.
        tp = max(128, (((tp + 1) // 2 + 127) // 128) * 128)
    hwp = ((HW + tp - 1) // tp) * tp
    return 1, tp, hwp


def csp_forward(x_nchw, params, *, compute_dtype=jnp.bfloat16,
                budget_bytes_override=None):
    """x_nchw: (N, Cin, H, W). Returns (N, Cout, H, W) in x_nchw.dtype.

    compute_dtype is the dtype fed to the MXU (accumulation is always f32).
    In a full network the producer of x should emit this dtype directly; here
    the cast sits at the pallas_call boundary so XLA can fuse it upstream.
    """
    w1 = params["w1"][:, :, 0, 0]   # (half, Cin)
    b1 = params["b1"]               # (half,)
    w2 = params["w2"][:, :, 0, 0]   # (half, Cin)
    b2 = params["b2"]               # (half,)
    w3 = params["w3"][:, :, 0, 0]   # (Cout, Cout)
    b3 = params["b3"]               # (Cout,)

    N, Cin, H, W = x_nchw.shape
    half = w1.shape[0]
    Cout = w3.shape[0]
    HW = H * W

    # Algebraic fusion of the three 1x1 convs — done in f32, cast once.
    w3a = w3[:, :half].astype(jnp.float32)
    w3b = w3[:, half:].astype(jnp.float32)
    w_fused = w3a @ w1.astype(jnp.float32) + w3b @ w2.astype(jnp.float32)
    b_fused = (w3a @ b1.astype(jnp.float32) + w3b @ b2.astype(jnp.float32)
               + b3.astype(jnp.float32)).reshape(Cout, 1)

    compute_dtype = jnp.dtype(compute_dtype)
    out_dtype = x_nchw.dtype
    block_budget, vmem_limit = _vmem_budgets()
    if budget_bytes_override is not None:
        block_budget = budget_bytes_override

    nb, tp, hwp = _choose_tiling(
        N, Cin, Cout, HW,
        compute_dtype.itemsize, jnp.dtype(out_dtype).itemsize, block_budget)

    # Free reshape in NCHW: (N, Cin, H, W) -> (N, Cin, H*W). No transpose.
    x3d = x_nchw.reshape(N, Cin, HW).astype(compute_dtype)
    if hwp != HW:
        x3d = jnp.pad(x3d, ((0, 0), (0, 0), (0, hwp - HW)))
    w_k = w_fused.astype(compute_dtype)

    grid = (N // nb, hwp // tp)

    out3d = pl.pallas_call(
        _make_csp_kernel(nb),
        out_shape=jax.ShapeDtypeStruct((N, Cout, hwp), out_dtype),
        grid_spec=pltpu.PrefetchScalarGridSpec(
            num_scalar_prefetch=0,
            grid=grid,
            in_specs=[
                pl.BlockSpec((nb, Cin, tp), lambda n, p: (n, 0, p)),   # x block
                pl.BlockSpec((Cout, Cin), lambda n, p: (0, 0)),        # W_fused
                pl.BlockSpec((Cout, 1), lambda n, p: (0, 0)),          # b_fused
            ],
            out_specs=pl.BlockSpec((nb, Cout, tp), lambda n, p: (n, 0, p)),
        ),
        compiler_params=pltpu.CompilerParams(
            dimension_semantics=("parallel", "parallel"),
            vmem_limit_bytes=int(vmem_limit)),
    )(x3d, w_k, b_fused)

    if hwp != HW:
        out3d = out3d[:, :, :HW]
    return out3d.reshape(N, Cout, H, W)


def init_params(key, in_channels, out_channels):
    half = out_channels // 2
    ks = jax.random.split(key, 6)

    # PyTorch Conv2d default init: U(-1/sqrt(fan_in), 1/sqrt(fan_in))
    def u(k, shape, fan_in):
        bound = 1.0 / jnp.sqrt(fan_in)
        return jax.random.uniform(k, shape, jnp.float32, -bound, bound)

    return {
        "w1": u(ks[0], (half, in_channels, 1, 1), in_channels),
        "b1": u(ks[1], (half,), in_channels),
        "w2": u(ks[2], (half, in_channels, 1, 1), in_channels),
        "b2": u(ks[3], (half,), in_channels),
        "w3": u(ks[4], (out_channels, out_channels, 1, 1), out_channels),
        "b3": u(ks[5], (out_channels,), out_channels),
    }


def csp_reference(x_nchw, params):
    """Pure-JAX reference matching the unfused PyTorch forward (f32)."""
    w1 = params["w1"][:, :, 0, 0]; b1 = params["b1"]
    w2 = params["w2"][:, :, 0, 0]; b2 = params["b2"]
    w3 = params["w3"][:, :, 0, 0]; b3 = params["b3"]
    x1 = jnp.einsum("nchw,oc->nohw", x_nchw, w1) + b1[None, :, None, None]
    x2 = jnp.einsum("nchw,oc->nohw", x_nchw, w2) + b2[None, :, None, None]
    h = jnp.concatenate([x1, x2], axis=1)
    return jnp.einsum("nchw,oc->nohw", h, w3) + b3[None, :, None, None]


if __name__ == "__main__":
    # (N, Cin, Cout, H, W, compute_dtype, budget_override, tol)
    cases = [
        (2, 4, 8, 16, 16, jnp.bfloat16, None, 5e-2),   # default bf16 operand path
        (2, 4, 8, 16, 16, jnp.float32, None, 1e-4),    # f32 path, tight check
        (4, 8, 16, 8, 8, jnp.float32, None, 1e-4),     # nb=2 image batching, HW<128 full-extent
        (1, 4, 8, 16, 16, jnp.float32, 4096, 1e-4),    # forced pixel tiling (tp=128, 2 steps)
        (1, 4, 8, 10, 10, jnp.float32, 2048, 1e-4),    # forced pixel padding (HW=100 -> 128)
    ]
    keys = jax.random.split(jax.random.PRNGKey(0), len(cases))
    for key, (N, Cin, Cout, H, W, cdt, budget, tol) in zip(keys, cases):
        kx, kp = jax.random.split(key)
        x = jax.random.normal(kx, (N, Cin, H, W), jnp.float32)
        params = init_params(kp, Cin, Cout)
        out = csp_forward(x, params, compute_dtype=cdt,
                          budget_bytes_override=budget)
        out = jax.block_until_ready(out)
        ref = csp_reference(x, params)
        assert out.shape == ref.shape
        assert jnp.allclose(out, ref, atol=tol, rtol=tol), (
            f"mismatch: N={N} Cin={Cin} Cout={Cout} H={H} W={W} dtype={cdt} "
            f"max_err={float(jnp.max(jnp.abs(out - ref)))}")

    print("KERNEL_OK")
</pallas_src>

<mosaic_0001>
module attributes {stable_mosaic.version = 11 : i64} {
  func.func @kernel(%arg0: i32, %arg1: i32, %arg2: memref<1x4x256xbf16, #tpu.memory_space<vmem>>, %arg3: memref<8x4xbf16, #tpu.memory_space<vmem>>, %arg4: memref<8x1xf32, #tpu.memory_space<vmem>>, %arg5: memref<1x8x256xf32, #tpu.memory_space<vmem>>) attributes {dimension_semantics = [#tpu.dimension_semantics<parallel>, #tpu.dimension_semantics<parallel>], iteration_bounds = array<i64: 2, 1>, scalar_prefetch = 0 : i64, scratch_operands = 0 : i64, tpu.core_type = #tpu.core_type<tc>, window_params = [{transform_indices = @transform_0, window_bounds = array<i64: 1, 4, 256>}, {pipeline_mode = #tpu.pipeline_mode<synchronous>, transform_indices = @transform_1, window_bounds = array<i64: 8, 4>}, {pipeline_mode = #tpu.pipeline_mode<synchronous>, transform_indices = @transform_2, window_bounds = array<i64: 8, 1>}, {transform_indices = @transform_3, window_bounds = array<i64: 1, 8, 256>}]} {
    %c0 = arith.constant 0 : index
    %c0_0 = arith.constant 0 : index
    %0 = vector.load %arg3[%c0, %c0_0] : memref<8x4xbf16, #tpu.memory_space<vmem>>, vector<8x4xbf16>
    %c0_1 = arith.constant 0 : index
    %c0_2 = arith.constant 0 : index
    %1 = vector.load %arg4[%c0_1, %c0_2] : memref<8x1xf32, #tpu.memory_space<vmem>>, vector<8x1xf32>
    %c0_i32 = arith.constant 0 : i32
    %2 = arith.index_cast %c0_i32 : i32 to index
    %c0_3 = arith.constant 0 : index
    %c0_4 = arith.constant 0 : index
    %3 = vector.load %arg2[%2, %c0_3, %c0_4] : memref<1x4x256xbf16, #tpu.memory_space<vmem>>, vector<1x4x256xbf16>
    %4 = vector.shape_cast %3 : vector<1x4x256xbf16> to vector<4x256xbf16>
    %cst = arith.constant dense<0.000000e+00> : vector<8x256xf32>
    %5 = tpu.matmul %0, %4, %cst {dimension_numbers = #tpu.dot_dimension_numbers<[1], [0], [0], [1], [0, 0, 1, 1], [], []>} : vector<8x4xbf16>, vector<4x256xbf16>, vector<8x256xf32> -> vector<8x256xf32>
    %6 = vector.broadcast %1 : vector<8x1xf32> to vector<8x256xf32>
    %7 = arith.addf %5, %6 : vector<8x256xf32>
    %8 = arith.index_cast %c0_i32 : i32 to index
    %c0_5 = arith.constant 0 : index
    %c0_6 = arith.constant 0 : index
    %9 = vector.load %arg5[%8, %c0_5, %c0_6] : memref<1x8x256xf32, #tpu.memory_space<vmem>>, vector<1x8x256xf32>
    %10 = vector.shape_cast %9 : vector<1x8x256xf32> to vector<8x256xf32>
    %11 = vector.shape_cast %7 : vector<8x256xf32> to vector<1x8x256xf32>
    tpu.vector_store %arg5[%8, %c0_5, %c0_6], %11 {strides = array<i32>} : memref<1x8x256xf32, #tpu.memory_space<vmem>>, vector<1x8x256xf32>,
    %c1_i32 = arith.constant 1 : i32
    return
  }
  func.func @transform_0(%arg0: i32, %arg1: i32) -> (i32, i32, i32) {
    %c0_i32 = arith.constant 0 : i32
    %c0_i32_0 = arith.constant 0 : i32
    return %arg0, %c0_i32, %arg1 : i32, i32, i32
  }
  func.func @transform_1(%arg0: i32, %arg1: i32) -> (i32, i32) {
    %c0_i32 = arith.constant 0 : i32
    %c0_i32_0 = arith.constant 0 : i32
    %c0_i32_1 = arith.constant 0 : i32
    return %c0_i32, %c0_i32_0 : i32, i32
  }
  func.func @transform_2(%arg0: i32, %arg1: i32) -> (i32, i32) {
    %c0_i32 = arith.constant 0 : i32
    %c0_i32_0 = arith.constant 0 : i32
    %c0_i32_1 = arith.constant 0 : i32
    return %c0_i32, %c0_i32_0 : i32, i32
  }
  func.func @transform_3(%arg0: i32, %arg1: i32) -> (i32, i32, i32) {
    %c0_i32 = arith.constant 0 : i32
    %c0_i32_0 = arith.constant 0 : i32
    return %arg0, %c0_i32, %arg1 : i32, i32, i32
  }
}

</mosaic_0001>

<bundles_post_ra>
// kernel: tpu_custom_call.1
= control target key start
LH: loop header
LB: loop body
LE: loop exit
PB: predicated region body
PF: predicated region fallthrough
CT: control target
= control target key end

     0   :  { %8 = vsyncpa [#allocation3], 0  ;;  %s623_s0 = inlined_call_operand.vmem [shape: bf16[2,4,256], index: 0, kind: input, shape index: {}]   ;;  %s624_s1 = inlined_call_operand.vmem [shape: bf16[8,4], index: 1, kind: input, shape index: {}]   ;;  %s625_s2 = inlined_call_operand.vmem [shape: f32[8,1], index: 2, kind: input, shape index: {}]   ;;  %s626_s3 = inlined_call_operand.hbm [shape: f32[2,8,256], index: 3, kind: output, shape index: {}]  }
   0x1   :  { %10 = vsyncpa [#allocation3 + $0x1], 0  ;;  %s520_s12 = smov 0   ;;  %s522_s13 = smov 0  }
   0x2   :  { %s524_s14 = smov 0   ;;  %s526_s15 = smov 0  }
   0x3   :  { %s528_s16 = smov 0   ;;  %s530_s17 = smov 0  }
   0x4 LB: > { %s345_s18 = sadd.s32 4294967295, %s497_s17   ;;  %s346_s19 = sadd.s32 4294967294, %s497_s17   ;;  %s497_s17 = sphi %s530_s17, %s16_s17   ;;  %s493_s16 = sphi %s528_s16, %s633_s16   ;;  %s489_s15 = sphi %s526_s15, %s632_s15   ;;  %s485_s14 = sphi %s524_s14, %s631_s14   ;;  %s481_s13 = sphi %s522_s13, %s630_s13   ;;  %s477_s12 = sphi %s520_s12, %s629_s12  }
   0x5   : > { %s28_s20 = sadd.s32 1, %s493_s16  ;;  %s107_s21 = sadd.s32 1, %s485_s14 }
   0x6   : > { %p30_p0 = scmp.ge.s32.totalorder %s28_s20, 2  ;;  %p117_p1 = scmp.ne.s32.totalorder %s485_s14, %s481_s13 }
   0x7   : > { %p118_p2 = scmp.eq.s32.totalorder %s345_s18, 1  ;;  %p123_p3 = scmp.ne.s32.totalorder %s481_s13, %s477_s12 }
   0x8   : > { %s635_s20 = smov (%p30_p0, %s28_s20), 0  ;;  %p124_p5 = scmp.eq.s32.totalorder %s346_s19, 1 }
   0x9   : > { %p560_p4 = por %p118_p2, %p117_p1  ;;  %s102_s23 = ssub.s32 %s493_s16, %s635_s20 }
   0xa   : > { %p349_p6 = scmp.ge.s32.totalorder %s497_s17, 1  ;;  %p105_p7 = scmp.eq.s32.totalorder %s102_s23, 0 }
   0xb   : > { %p567_p8 = por %p124_p5, %p123_p3  ;;  %p161_p9 = scmp.lt.s32.totalorder %s497_s17, 3 }
   0xc   : > { %s573_s25 = scalar_select %p105_p7, %s485_s14, %s107_s21  }
   0xd   : > { %p162_p10 = pnand %p349_p6, %p161_p9 }
   0xe   : > { %p190_p11 = scmp.lt.s32.totalorder (!%p162_p10), %s489_s15, 1  ;;  %s186_s8 = sand.u32 (!%p162_p10), 1, %s481_s13  }
   0xf   : > { %165 = sbr.rel (%p162_p10) target bundleno = 171 (0xab), region = 32  ;;  %s361_s9 = sshll.u32 (!%p162_p10), %s489_s15, 4 }
  0x10   : > { %s350_s10 = sshll.u32 (!%p162_p10), %s186_s8, 4  ;;  %s264_s19 = scalar_lea.hbm (!%p162_p10), %s626_s3, %s361_s9 }
  0x11   : > { %s188_s21 = scalar_lea.vmem (!%p162_p10), [#allocation2], %s350_s10  ;;  %s268_s26 = sshll.u32 (!%p162_p10), %s264_s19, 4  ;;  %s269_s26 = int_to_ptr.hbm [resolvable:$true] %s268_s26 }
  0x12   : > { %s266_s23 = sshll.u32 (!%p162_p10), %s188_s21, 4  ;;  %s251_s27 = scalar_lea.sflag (!%p162_p10), [#allocation3], %s186_s8  ;;  %s267_s23 = int_to_ptr.vmem [resolvable:$true] %s266_s23 }
  0x13   : > { %s439_s4 = scalar_lea.hbm (!%p162_p10), %s626_s3, 32 }
  0x14   : > { %v499_v0 = vmov 0   ;;  %v202_v1 = vld [vmem:[%s625_s2] sm:$0xff]  ;;  %s191_s28 = scalar_select %p190_p11, %s489_s15, 1  ;;  %vm217_vm0 = vcmask 1041408   ;;  %vm213_vm1 = vcmask 31744  }
  0x15   : > { %418 = vset.pattern.permute.xlu0 %v499_v0  ;;  %v201_v7 = vld [vmem:[%s624_s1] sm:$0xf]  ;;  %s433_s15 = sshra.s32 %s269_s26, 4  ;;  %s434_s15 = int_to_ptr.hbm [resolvable:$true] %s433_s15 }
  0x16   : > { %206 = vperm.xlu0 %418, %v202_v1   ;;  %s360_s29 = sshll.u32 %s191_s28, 2  ;;  %s435_s28 = scalar_lea.hbm %s434_s15, 16 }
  0x17   : > { %s197_s5 = scalar_lea.vmem %s623_s0, %s360_s29  ;;  %p436_p12 = scmp.ne.s32.totalorder %s434_s15, %s435_s28 }
  0x18   : > { %v203_v2 = vld [vmem:[%s197_s5] sm:$0xf]  ;;  %p440_p1 = scmp.lt.s32.totalorder %s434_s15, %s626_s3  ;;  %p441_p2 = scmp.lt.s32.totalorder %s439_s4, %s435_s28 }
  0x19   : > { %210 = vst [vmem:[#allocation1] ss:$4 sm:$0xff] %v203_v2  ;;  %p437_p13 = pnand %p436_p12, %p560_p4 }
  0x1a   : > { %p442_p3 = por %p441_p2, %p440_p1 }
  0x1b   : > { %p438_p0 = pneg %p437_p13 }
  0x1d   : > { %p443_p5 = pnand %p442_p3, %p438_p0 }
  0x20   : > { %v211_v3 = vld.sshfl [vmem:[#allocation1] sm:$0xff pattern:$0x73625140]  ;;  %v212_v4 = vld.sshfl [vmem:[#allocation1 + $0x8] sm:$0xff pattern:$0x73625140] }
  0x21   : > { %v218_v5 = vsel %vm217_vm0, %v211_v3, 0  ;;  %v220_v6 = vsel %vm217_vm0, %v212_v4, 0 }
  0x22   : > { %229 = vmatpush.bf16.msra.mxu0 %v218_v5  ;;  %242 = vmatpush.bf16.msra.mxu1 %v220_v6 }
  0x25   : > { %353 = vmatmul.msk.bf16.vlgmr.msra.gmra.mxu0 %vm213_vm1, %v201_v7  ;;  %354 = vmatmul.msk.bf16.vlgmr.msra.gmra.mxu1 %vm213_vm1, %v201_v7 }
  0x88   : > { %v207_v8 = vpop.permute.xlu0 %206 }
  0xa2   : > { %v231_v9 = vpop.f32.mrf.mxu0  ;;  %v244_v10 = vpop.f32.mrf.mxu1 }
  0xa3   : > { %v232_v11 = vadd.f32 %v231_v9, %v207_v8  ;;  %v245_v12 = vadd.f32 %v244_v10, %v207_v8 }
  0xa5   : > { %248 = vst [vmem:[%s188_s21] sm:$0xff] %v232_v11 }
  0xa6   : > { %249 = vst [vmem:[%s188_s21 + $0x8] sm:$0xff] %v245_v12 }
  0xa7   : > { %446 = shalt.err (!%p443_p5)
}
  0xa8   : > { %362 = dma.vmem_to_hbm [thread:$0]  (%p560_p4), %s267_s23, 256, %s269_s26, %s251_s27  }
  0xaa   : > { %v233_v13 = vpop.f32.mrf.mxu0  ;;  %v246_v14 = vpop.f32.mrf.mxu1 }
  0xab PF: > { %p368_p6 = scmp.ge.s32.totalorder %s497_s17, 2  ;;  %s280_s7 = sand.u32 1, %s477_s12  }
  0xac   : > { %s281_s8 = scalar_lea.sflag [#allocation3], %s280_s7 }
  0xad   : > { %p365_p7 = pnand %p368_p6, %p567_p8 }
  0xaf   : > { %p366_p9 = pneg %p365_p7 }
  0xb1   : > { %472 = dma.done.wait (%p366_p9), %s281_s8, 256  }
  0xb2   : > { %474 = vsyncadd (%p366_p9), %s281_s8, 4294967040  ;;  %s16_s17 = sadd.s32 1, %s497_s17   ;;  %s629_s12 = smov %s481_s13 }
  0xb3   : > { %p13_p10 = scmp.ge.s32.totalorder %s16_s17, 4   ;;  %s630_s13 = smov %s485_s14 }
  0xb4   : > { %s631_s14 = smov %s573_s25  ;;  %s632_s15 = smov %s493_s16 }
  0xb5   : > { %s633_s16 = smov %s635_s20  ;;  %15 = sbr.rel (!%p13_p10) target bundleno = 4 (0x4), region = 67 }
  0xba   :  { %287 = vsyncpa [#allocation3], 1 }
  0xbb   :  { %289 = vsyncpa [#allocation3 + $0x1], 1 }

</bundles_post_ra>
